<compile_context>
chip_gen: v7x
topology: tpu7x:2x2x1
jax: 0.10.0
libtpu: 0.0.40
codegen_flags: <defaults>
</compile_context>

<pallas_src>
import functools

import jax
import jax.numpy as jnp
from jax import lax
from jax.experimental import pallas as pl
from jax.experimental.pallas import tpu as pltpu


def _round_up(x, m):
    return (x + m - 1) // m * m


def _adapter_kernel(x_ref, w1_ref, b1_ref, w2_ref, b2_ref, g_ref, beta_ref,
                    o_ref, *, eps, valid_dim, matmul_dtype):
    # Residual / LayerNorm path in f32; matmul inputs in matmul_dtype (bf16 by
    # default) with f32 accumulation on the MXU.
    x32 = x_ref[...].astype(jnp.float32)                       # (bm, dim_p)
    xm = x_ref[...].astype(matmul_dtype)

    # net(x) = Linear2(ReLU(Linear1(x)))
    h = jnp.dot(xm, w1_ref[...], preferred_element_type=jnp.float32)
    h = jnp.maximum(h + b1_ref[...], 0.0)                      # (bm, hid_p)
    y = jnp.dot(h.astype(matmul_dtype), w2_ref[...],
                preferred_element_type=jnp.float32)
    y = y + b2_ref[...]                                        # (bm, dim_p)

    # residual; padded lanes of x and y are exactly zero by construction
    z = x32 + y

    dim_p = z.shape[-1]
    inv_d = jnp.float32(1.0 / valid_dim)
    if valid_dim != dim_p:
        # safety mask (padded lanes are already exactly 0, this is belt+braces)
        mask = lax.broadcasted_iota(jnp.int32, (1, dim_p), 1) < valid_dim
        zm = jnp.where(mask, z, 0.0)
    else:
        zm = z

    # fused LayerNorm moments: sum & sum-of-squares, scaled by 1/dim constant
    s = jnp.sum(zm, axis=-1, keepdims=True)
    ss = jnp.sum(zm * zm, axis=-1, keepdims=True)
    mean = s * inv_d
    var = jnp.maximum(ss * inv_d - mean * mean, 0.0)
    zn = (z - mean) * lax.rsqrt(var + eps)                     # rsqrt -> EUP

    o_ref[...] = (zn * g_ref[...] + beta_ref[...]).astype(o_ref.dtype)


def adapter_forward(x, w1, b1, w2, b2, gamma, beta, *, eps=1e-5, bm=None,
                    matmul_dtype=jnp.bfloat16):
    """x: (B, dim); w1: (dim, hidden); w2: (hidden, dim); 1-D params (hidden,)/(dim,)."""
    B, dim = x.shape
    dim_w, hidden = w1.shape
    assert dim_w == dim and w2.shape == (hidden, dim)

    LANE = 128
    dim_p = _round_up(dim, LANE)
    hid_p = _round_up(hidden, LANE)

    x_itemsize = jnp.dtype(x.dtype).itemsize
    out_dtype = x.dtype
    out_itemsize = jnp.dtype(out_dtype).itemsize
    w_itemsize = jnp.dtype(matmul_dtype).itemsize

    # ---- row-tile selection (large tiles; VMEM-aware; >=2 steps if possible) ----
    if bm is None:
        b_r = _round_up(B, 8)
        bm = min(512, b_r)
        if b_r >= 16 and b_r // bm < 2:
            # prefer at least 2 grid steps so megacore (v7x) can shard the batch
            bm = _round_up((b_r + 1) // 2, 8)
        # cap bm so double-buffered x/out tiles + f32 intermediates fit ~24 MiB
        per_row = (dim_p * x_itemsize * 2 + dim_p * out_itemsize * 2
                   + (hid_p + 2 * dim_p) * 4)
        bm_cap = max(8, ((24 << 20) // per_row) // 8 * 8)
        bm = min(bm, bm_cap)
    else:
        bm = _round_up(bm, 8)

    B_p = _round_up(B, bm)
    grid_steps = B_p // bm

    # ---- pad to lane-dense shapes (zero padding keeps the math exact) ----
    x_p = jnp.pad(x, ((0, B_p - B), (0, dim_p - dim)))
    w1_p = jnp.pad(w1, ((0, dim_p - dim), (0, hid_p - hidden))).astype(matmul_dtype)
    w2_p = jnp.pad(w2, ((0, hid_p - hidden), (0, dim_p - dim))).astype(matmul_dtype)
    b1_p = jnp.pad(b1, (0, hid_p - hidden)).reshape(1, hid_p).astype(jnp.float32)
    b2_p = jnp.pad(b2, (0, dim_p - dim)).reshape(1, dim_p).astype(jnp.float32)
    g_p = jnp.pad(gamma, (0, dim_p - dim)).reshape(1, dim_p).astype(jnp.float32)
    beta_p = jnp.pad(beta, (0, dim_p - dim)).reshape(1, dim_p).astype(jnp.float32)

    # NOTE: weights are held fully VMEM-resident; for very large dim/hidden a
    # K-tiled grid axis over the weights would be needed instead.
    w_bytes = (w1_p.size + w2_p.size) * w_itemsize \
        + (b1_p.size + b2_p.size + g_p.size + beta_p.size) * 4
    tile_bytes = bm * dim_p * x_itemsize * 2 + bm * dim_p * out_itemsize * 2
    scratch_bytes = bm * hid_p * 4 + 2 * bm * dim_p * 4
    vmem_limit = int(1.5 * (2 * w_bytes + tile_bytes + scratch_bytes)) + (8 << 20)
    vmem_limit = max(32 << 20, min(vmem_limit, 96 << 20))

    flops = 4 * B_p * dim_p * hid_p + 12 * B_p * dim_p
    bytes_accessed = (x_p.size * x_itemsize + B_p * dim_p * out_itemsize + w_bytes)

    kernel = functools.partial(_adapter_kernel, eps=float(eps), valid_dim=dim,
                               matmul_dtype=matmul_dtype)

    def _call(single_buffer_consts):
        const_kwargs = {}
        if single_buffer_consts:
            # grid-invariant operands do not need double buffering
            const_kwargs = dict(pipeline_mode=pl.Buffered(1))

        def const_spec(shape):
            return pl.BlockSpec(shape, lambda i: (0, 0), **const_kwargs)

        grid_spec = pltpu.PrefetchScalarGridSpec(
            num_scalar_prefetch=0,
            grid=(grid_steps,),
            in_specs=[
                pl.BlockSpec((bm, dim_p), lambda i: (i, 0)),   # x tile
                const_spec((dim_p, hid_p)),                    # W1
                const_spec((1, hid_p)),                        # b1
                const_spec((hid_p, dim_p)),                    # W2
                const_spec((1, dim_p)),                        # b2
                const_spec((1, dim_p)),                        # gamma
                const_spec((1, dim_p)),                        # beta
            ],
            out_specs=pl.BlockSpec((bm, dim_p), lambda i: (i, 0)),
        )
        return pl.pallas_call(
            kernel,
            out_shape=jax.ShapeDtypeStruct((B_p, dim_p), out_dtype),
            grid_spec=grid_spec,
            compiler_params=pltpu.CompilerParams(
                dimension_semantics=("parallel",),
                vmem_limit_bytes=vmem_limit),
            cost_estimate=pl.CostEstimate(
                flops=int(flops), transcendentals=int(B_p),
                bytes_accessed=int(bytes_accessed)),
        )(x_p, w1_p, b1_p, w2_p, b2_p, g_p, beta_p)

    try:
        out_p = _call(True)
    except Exception:
        # Fallback for JAX versions where BlockSpec pipeline_mode / Buffered(1)
        # is not supported for pallas_call on TPU.
        out_p = _call(False)

    return out_p[:B, :dim]


def adapter_reference(x, w1, b1, w2, b2, gamma, beta, eps=1e-5):
    h = jnp.maximum(x @ w1 + b1, 0.0)
    y = h @ w2 + b2
    z = x + y
    mean = jnp.mean(z, axis=-1, keepdims=True)
    var = jnp.mean((z - mean) ** 2, axis=-1, keepdims=True)
    return (z - mean) / jnp.sqrt(var + eps) * gamma + beta


if __name__ == "__main__":
    key = jax.random.PRNGKey(0)

    # Small synthetic Adapter(dim=32, hidden_dim=64); dim < 128 exercises the
    # lane-padding path.
    B, dim, hidden = 8, 32, 64
    k = jax.random.split(key, 7)
    x = jax.random.normal(k[0], (B, dim), dtype=jnp.float32)
    w1 = jax.random.normal(k[1], (dim, hidden), dtype=jnp.float32) / jnp.sqrt(dim)
    b1 = jax.random.normal(k[2], (hidden,), dtype=jnp.float32) * 0.01
    w2 = jax.random.normal(k[3], (hidden, dim), dtype=jnp.float32) / jnp.sqrt(hidden)
    b2 = jax.random.normal(k[4], (dim,), dtype=jnp.float32) * 0.01
    gamma = jnp.ones((dim,), dtype=jnp.float32)
    beta = jnp.zeros((dim,), dtype=jnp.float32)

    ref = adapter_reference(x, w1, b1, w2, b2, gamma, beta)

    # f32 MXU path: tight correctness check.
    out_f32 = jax.block_until_ready(
        adapter_forward(x, w1, b1, w2, b2, gamma, beta, matmul_dtype=jnp.float32))
    assert out_f32.shape == (B, dim)
    assert jnp.allclose(out_f32, ref, atol=1e-4, rtol=1e-4), "f32 mismatch vs reference"

    # Default bf16-in / f32-acc MXU path: loose tolerance for bf16 rounding.
    out_bf16 = jax.block_until_ready(adapter_forward(x, w1, b1, w2, b2, gamma, beta))
    assert out_bf16.shape == (B, dim)
    assert jnp.allclose(out_bf16, ref, atol=1e-1, rtol=1e-1), "bf16 mismatch vs reference"

    # Second config: already lane-aligned shapes and >1 grid step (batch sharding).
    B2, dim2, hid2 = 64, 256, 512
    k2 = jax.random.split(jax.random.PRNGKey(1), 5)
    x2 = jax.random.normal(k2[0], (B2, dim2), dtype=jnp.float32)
    w1b = jax.random.normal(k2[1], (dim2, hid2), dtype=jnp.float32) / jnp.sqrt(dim2)
    b1b = jax.random.normal(k2[2], (hid2,), dtype=jnp.float32) * 0.01
    w2b = jax.random.normal(k2[3], (hid2, dim2), dtype=jnp.float32) / jnp.sqrt(hid2)
    b2b = jax.random.normal(k2[4], (dim2,), dtype=jnp.float32) * 0.01
    g2 = jnp.ones((dim2,), dtype=jnp.float32)
    be2 = jnp.zeros((dim2,), dtype=jnp.float32)

    out2 = jax.block_until_ready(adapter_forward(x2, w1b, b1b, w2b, b2b, g2, be2))
    ref2 = adapter_reference(x2, w1b, b1b, w2b, b2b, g2, be2)
    assert out2.shape == (B2, dim2)
    assert jnp.allclose(out2, ref2, atol=1e-1, rtol=1e-1), "mismatch vs reference (cfg 2)"

    print("KERNEL_OK")
</pallas_src>

<mosaic_0001>
module attributes {stable_mosaic.version = 11 : i64} {
  func.func @_adapter_kernel(%arg0: i32, %arg1: memref<8x128xf32, #tpu.memory_space<vmem>>, %arg2: memref<128x128xf32, #tpu.memory_space<vmem>>, %arg3: memref<1x128xf32, #tpu.memory_space<vmem>>, %arg4: memref<128x128xf32, #tpu.memory_space<vmem>>, %arg5: memref<1x128xf32, #tpu.memory_space<vmem>>, %arg6: memref<1x128xf32, #tpu.memory_space<vmem>>, %arg7: memref<1x128xf32, #tpu.memory_space<vmem>>, %arg8: memref<8x128xf32, #tpu.memory_space<vmem>>) attributes {dimension_semantics = [#tpu.dimension_semantics<parallel>], iteration_bounds = array<i64: 1>, scalar_prefetch = 0 : i64, scratch_operands = 0 : i64, tpu.core_type = #tpu.core_type<tc>, window_params = [{transform_indices = @transform_0, window_bounds = array<i64: 8, 128>}, {pipeline_mode = #tpu.pipeline_mode<synchronous>, transform_indices = @transform_1, window_bounds = array<i64: 128, 128>}, {pipeline_mode = #tpu.pipeline_mode<synchronous>, transform_indices = @transform_2, window_bounds = array<i64: 1, 128>}, {pipeline_mode = #tpu.pipeline_mode<synchronous>, transform_indices = @transform_3, window_bounds = array<i64: 128, 128>}, {pipeline_mode = #tpu.pipeline_mode<synchronous>, transform_indices = @transform_4, window_bounds = array<i64: 1, 128>}, {pipeline_mode = #tpu.pipeline_mode<synchronous>, transform_indices = @transform_5, window_bounds = array<i64: 1, 128>}, {pipeline_mode = #tpu.pipeline_mode<synchronous>, transform_indices = @transform_6, window_bounds = array<i64: 1, 128>}, {transform_indices = @transform_7, window_bounds = array<i64: 8, 128>}]} {
    %c0 = arith.constant 0 : index
    %c0_0 = arith.constant 0 : index
    %0 = vector.load %arg1[%c0, %c0_0] : memref<8x128xf32, #tpu.memory_space<vmem>>, vector<8x128xf32>
    %c0_1 = arith.constant 0 : index
    %c0_2 = arith.constant 0 : index
    %1 = vector.load %arg1[%c0_1, %c0_2] : memref<8x128xf32, #tpu.memory_space<vmem>>, vector<8x128xf32>
    %c0_3 = arith.constant 0 : index
    %c0_4 = arith.constant 0 : index
    %2 = vector.load %arg2[%c0_3, %c0_4] : memref<128x128xf32, #tpu.memory_space<vmem>>, vector<128x128xf32>
    %cst = arith.constant dense<0.000000e+00> : vector<8x128xf32>
    %3 = tpu.matmul %1, %2, %cst {dimension_numbers = #tpu.dot_dimension_numbers<[1], [0], [0], [1], [0, 0, 1, 1], [], []>} : vector<8x128xf32>, vector<128x128xf32>, vector<8x128xf32> -> vector<8x128xf32>
    %c0_5 = arith.constant 0 : index
    %c0_6 = arith.constant 0 : index
    %4 = vector.load %arg3[%c0_5, %c0_6] : memref<1x128xf32, #tpu.memory_space<vmem>>, vector<1x128xf32>
    %5 = vector.broadcast %4 : vector<1x128xf32> to vector<8x128xf32>
    %6 = arith.addf %3, %5 : vector<8x128xf32>
    %cst_7 = arith.constant 0.000000e+00 : f32
    %7 = vector.broadcast %cst_7 : f32 to vector<8x128xf32>
    %8 = arith.maximumf %6, %7 : vector<8x128xf32>
    %c0_8 = arith.constant 0 : index
    %c0_9 = arith.constant 0 : index
    %9 = vector.load %arg4[%c0_8, %c0_9] : memref<128x128xf32, #tpu.memory_space<vmem>>, vector<128x128xf32>
    %cst_10 = arith.constant dense<0.000000e+00> : vector<8x128xf32>
    %10 = tpu.matmul %8, %9, %cst_10 {dimension_numbers = #tpu.dot_dimension_numbers<[1], [0], [0], [1], [0, 0, 1, 1], [], []>} : vector<8x128xf32>, vector<128x128xf32>, vector<8x128xf32> -> vector<8x128xf32>
    %c0_11 = arith.constant 0 : index
    %c0_12 = arith.constant 0 : index
    %11 = vector.load %arg5[%c0_11, %c0_12] : memref<1x128xf32, #tpu.memory_space<vmem>>, vector<1x128xf32>
    %12 = vector.broadcast %11 : vector<1x128xf32> to vector<8x128xf32>
    %13 = arith.addf %10, %12 : vector<8x128xf32>
    %14 = arith.addf %0, %13 : vector<8x128xf32>
    %15 = tpu.iota {dimensions = array<i32: 1>} : vector<1x128xi32>
    %c32_i32 = arith.constant 32 : i32
    %16 = vector.broadcast %c32_i32 : i32 to vector<1x128xi32>
    %17 = arith.cmpi slt, %15, %16 : vector<1x128xi32>
    %cst_13 = arith.constant 0.000000e+00 : f32
    %18 = vector.shape_cast %17 : vector<1x128xi1> to vector<1x128xi1>
    %19 = vector.broadcast %18 : vector<1x128xi1> to vector<8x128xi1>
    %20 = vector.broadcast %cst_13 : f32 to vector<8x128xf32>
    %21 = arith.select %19, %14, %20 : vector<8x128xi1>, vector<8x128xf32>
    %cst_14 = arith.constant dense<0.000000e+00> : vector<8xf32>
    %22 = vector.multi_reduction <add>, %21, %cst_14 [1] : vector<8x128xf32> to vector<8xf32>
    %23 = vector.shape_cast %22 : vector<8xf32> to vector<8x1xf32>
    %24 = arith.mulf %21, %21 : vector<8x128xf32>
    %cst_15 = arith.constant dense<0.000000e+00> : vector<8xf32>
    %25 = vector.multi_reduction <add>, %24, %cst_15 [1] : vector<8x128xf32> to vector<8xf32>
    %26 = vector.shape_cast %25 : vector<8xf32> to vector<8x1xf32>
    %cst_16 = arith.constant 3.125000e-02 : f32
    %27 = vector.broadcast %cst_16 : f32 to vector<8x1xf32>
    %28 = arith.mulf %23, %27 : vector<8x1xf32>
    %cst_17 = arith.constant 3.125000e-02 : f32
    %29 = vector.broadcast %cst_17 : f32 to vector<8x1xf32>
    %30 = arith.mulf %26, %29 : vector<8x1xf32>
    %31 = arith.mulf %28, %28 : vector<8x1xf32>
    %32 = arith.subf %30, %31 : vector<8x1xf32>
    %cst_18 = arith.constant 0.000000e+00 : f32
    %33 = vector.broadcast %cst_18 : f32 to vector<8x1xf32>
    %34 = arith.maximumf %32, %33 : vector<8x1xf32>
    %35 = vector.broadcast %28 : vector<8x1xf32> to vector<8x128xf32>
    %36 = arith.subf %14, %35 : vector<8x128xf32>
    %cst_19 = arith.constant 9.99999974E-6 : f32
    %37 = vector.broadcast %cst_19 : f32 to vector<8x1xf32>
    %38 = arith.addf %34, %37 : vector<8x1xf32>
    %39 = math.rsqrt %38 : vector<8x1xf32>
    %40 = vector.broadcast %39 : vector<8x1xf32> to vector<8x128xf32>
    %41 = arith.mulf %36, %40 : vector<8x128xf32>
    %c0_20 = arith.constant 0 : index
    %c0_21 = arith.constant 0 : index
    %42 = vector.load %arg6[%c0_20, %c0_21] : memref<1x128xf32, #tpu.memory_space<vmem>>, vector<1x128xf32>
    %43 = vector.broadcast %42 : vector<1x128xf32> to vector<8x128xf32>
    %44 = arith.mulf %41, %43 : vector<8x128xf32>
    %c0_22 = arith.constant 0 : index
    %c0_23 = arith.constant 0 : index
    %45 = vector.load %arg7[%c0_22, %c0_23] : memref<1x128xf32, #tpu.memory_space<vmem>>, vector<1x128xf32>
    %46 = vector.broadcast %45 : vector<1x128xf32> to vector<8x128xf32>
    %47 = arith.addf %44, %46 : vector<8x128xf32>
    %c0_24 = arith.constant 0 : index
    %c0_25 = arith.constant 0 : index
    %48 = vector.load %arg8[%c0_24, %c0_25] : memref<8x128xf32, #tpu.memory_space<vmem>>, vector<8x128xf32>
    tpu.vector_store %arg8[%c0_24, %c0_25], %47 {strides = array<i32>} : memref<8x128xf32, #tpu.memory_space<vmem>>, vector<8x128xf32>,
    return
  }
  func.func @transform_0(%arg0: i32) -> (i32, i32) {
    %c0_i32 = arith.constant 0 : i32
    %c0_i32_0 = arith.constant 0 : i32
    return %arg0, %c0_i32 : i32, i32
  }
  func.func @transform_1(%arg0: i32) -> (i32, i32) {
    %c0_i32 = arith.constant 0 : i32
    %c0_i32_0 = arith.constant 0 : i32
    %c0_i32_1 = arith.constant 0 : i32
    return %c0_i32, %c0_i32_0 : i32, i32
  }
  func.func @transform_2(%arg0: i32) -> (i32, i32) {
    %c0_i32 = arith.constant 0 : i32
    %c0_i32_0 = arith.constant 0 : i32
    %c0_i32_1 = arith.constant 0 : i32
    return %c0_i32, %c0_i32_0 : i32, i32
  }
  func.func @transform_3(%arg0: i32) -> (i32, i32) {
    %c0_i32 = arith.constant 0 : i32
    %c0_i32_0 = arith.constant 0 : i32
    %c0_i32_1 = arith.constant 0 : i32
    return %c0_i32, %c0_i32_0 : i32, i32
  }
  func.func @transform_4(%arg0: i32) -> (i32, i32) {
    %c0_i32 = arith.constant 0 : i32
    %c0_i32_0 = arith.constant 0 : i32
    %c0_i32_1 = arith.constant 0 : i32
    return %c0_i32, %c0_i32_0 : i32, i32
  }
  func.func @transform_5(%arg0: i32) -> (i32, i32) {
    %c0_i32 = arith.constant 0 : i32
    %c0_i32_0 = arith.constant 0 : i32
    %c0_i32_1 = arith.constant 0 : i32
    return %c0_i32, %c0_i32_0 : i32, i32
  }
  func.func @transform_6(%arg0: i32) -> (i32, i32) {
    %c0_i32 = arith.constant 0 : i32
    %c0_i32_0 = arith.constant 0 : i32
    %c0_i32_1 = arith.constant 0 : i32
    return %c0_i32, %c0_i32_0 : i32, i32
  }
  func.func @transform_7(%arg0: i32) -> (i32, i32) {
    %c0_i32 = arith.constant 0 : i32
    %c0_i32_0 = arith.constant 0 : i32
    return %arg0, %c0_i32 : i32, i32
  }
}

module attributes {stable_mosaic.version = 11 : i64} {
  func.func @_adapter_kernel(%arg0: i32, %arg1: memref<8x128xf32, #tpu.memory_space<vmem>>, %arg2: memref<128x128xf32, #tpu.memory_space<vmem>>, %arg3: memref<1x128xf32, #tpu.memory_space<vmem>>, %arg4: memref<128x128xf32, #tpu.memory_space<vmem>>, %arg5: memref<1x128xf32, #tpu.memory_space<vmem>>, %arg6: memref<1x128xf32, #tpu.memory_space<vmem>>, %arg7: memref<1x128xf32, #tpu.memory_space<vmem>>, %arg8: memref<8x128xf32, #tpu.memory_space<vmem>>) attributes {dimension_semantics = [#tpu.dimension_semantics<parallel>], iteration_bounds = array<i64: 1>, scalar_prefetch = 0 : i64, scratch_operands = 0 : i64, tpu.core_type = #tpu.core_type<tc>, window_params = [{transform_indices = @transform_0, window_bounds = array<i64: 8, 128>}, {pipeline_mode = #tpu.pipeline_mode<synchronous>, transform_indices = @transform_1, window_bounds = array<i64: 128, 128>}, {pipeline_mode = #tpu.pipeline_mode<synchronous>, transform_indices = @transform_2, window_bounds = array<i64: 1, 128>}, {pipeline_mode = #tpu.pipeline_mode<synchronous>, transform_indices = @transform_3, window_bounds = array<i64: 128, 128>}, {pipeline_mode = #tpu.pipeline_mode<synchronous>, transform_indices = @transform_4, window_bounds = array<i64: 1, 128>}, {pipeline_mode = #tpu.pipeline_mode<synchronous>, transform_indices = @transform_5, window_bounds = array<i64: 1, 128>}, {pipeline_mode = #tpu.pipeline_mode<synchronous>, transform_indices = @transform_6, window_bounds = array<i64: 1, 128>}, {transform_indices = @transform_7, window_bounds = array<i64: 8, 128>}]} {
    %c0 = arith.constant 0 : index
    %c0_0 = arith.constant 0 : index
    %0 = vector.load %arg1[%c0, %c0_0] : memref<8x128xf32, #tpu.memory_space<vmem>>, vector<8x128xf32>
    %c0_1 = arith.constant 0 : index
    %c0_2 = arith.constant 0 : index
    %1 = vector.load %arg1[%c0_1, %c0_2] : memref<8x128xf32, #tpu.memory_space<vmem>>, vector<8x128xf32>
    %c0_3 = arith.constant 0 : index
    %c0_4 = arith.constant 0 : index
    %2 = vector.load %arg2[%c0_3, %c0_4] : memref<128x128xf32, #tpu.memory_space<vmem>>, vector<128x128xf32>
    %cst = arith.constant dense<0.000000e+00> : vector<8x128xf32>
    %3 = tpu.matmul %1, %2, %cst {dimension_numbers = #tpu.dot_dimension_numbers<[1], [0], [0], [1], [0, 0, 1, 1], [], []>} : vector<8x128xf32>, vector<128x128xf32>, vector<8x128xf32> -> vector<8x128xf32>
    %c0_5 = arith.constant 0 : index
    %c0_6 = arith.constant 0 : index
    %4 = vector.load %arg3[%c0_5, %c0_6] : memref<1x128xf32, #tpu.memory_space<vmem>>, vector<1x128xf32>
    %5 = vector.broadcast %4 : vector<1x128xf32> to vector<8x128xf32>
    %6 = arith.addf %3, %5 : vector<8x128xf32>
    %cst_7 = arith.constant 0.000000e+00 : f32
    %7 = vector.broadcast %cst_7 : f32 to vector<8x128xf32>
    %8 = arith.maximumf %6, %7 : vector<8x128xf32>
    %c0_8 = arith.constant 0 : index
    %c0_9 = arith.constant 0 : index
    %9 = vector.load %arg4[%c0_8, %c0_9] : memref<128x128xf32, #tpu.memory_space<vmem>>, vector<128x128xf32>
    %cst_10 = arith.constant dense<0.000000e+00> : vector<8x128xf32>
    %10 = tpu.matmul %8, %9, %cst_10 {dimension_numbers = #tpu.dot_dimension_numbers<[1], [0], [0], [1], [0, 0, 1, 1], [], []>} : vector<8x128xf32>, vector<128x128xf32>, vector<8x128xf32> -> vector<8x128xf32>
    %c0_11 = arith.constant 0 : index
    %c0_12 = arith.constant 0 : index
    %11 = vector.load %arg5[%c0_11, %c0_12] : memref<1x128xf32, #tpu.memory_space<vmem>>, vector<1x128xf32>
    %12 = vector.broadcast %11 : vector<1x128xf32> to vector<8x128xf32>
    %13 = arith.addf %10, %12 : vector<8x128xf32>
    %14 = arith.addf %0, %13 : vector<8x128xf32>
    %15 = tpu.iota {dimensions = array<i32: 1>} : vector<1x128xi32>
    %c32_i32 = arith.constant 32 : i32
    %16 = vector.broadcast %c32_i32 : i32 to vector<1x128xi32>
    %17 = arith.cmpi slt, %15, %16 : vector<1x128xi32>
    %cst_13 = arith.constant 0.000000e+00 : f32
    %18 = vector.shape_cast %17 : vector<1x128xi1> to vector<1x128xi1>
    %19 = vector.broadcast %18 : vector<1x128xi1> to vector<8x128xi1>
    %20 = vector.broadcast %cst_13 : f32 to vector<8x128xf32>
    %21 = arith.select %19, %14, %20 : vector<8x128xi1>, vector<8x128xf32>
    %cst_14 = arith.constant dense<0.000000e+00> : vector<8xf32>
    %22 = vector.multi_reduction <add>, %21, %cst_14 [1] : vector<8x128xf32> to vector<8xf32>
    %23 = vector.shape_cast %22 : vector<8xf32> to vector<8x1xf32>
    %24 = arith.mulf %21, %21 : vector<8x128xf32>
    %cst_15 = arith.constant dense<0.000000e+00> : vector<8xf32>
    %25 = vector.multi_reduction <add>, %24, %cst_15 [1] : vector<8x128xf32> to vector<8xf32>
    %26 = vector.shape_cast %25 : vector<8xf32> to vector<8x1xf32>
    %cst_16 = arith.constant 3.125000e-02 : f32
    %27 = vector.broadcast %cst_16 : f32 to vector<8x1xf32>
    %28 = arith.mulf %23, %27 : vector<8x1xf32>
    %cst_17 = arith.constant 3.125000e-02 : f32
    %29 = vector.broadcast %cst_17 : f32 to vector<8x1xf32>
    %30 = arith.mulf %26, %29 : vector<8x1xf32>
    %31 = arith.mulf %28, %28 : vector<8x1xf32>
    %32 = arith.subf %30, %31 : vector<8x1xf32>
    %cst_18 = arith.constant 0.000000e+00 : f32
    %33 = vector.broadcast %cst_18 : f32 to vector<8x1xf32>
    %34 = arith.maximumf %32, %33 : vector<8x1xf32>
    %35 = vector.broadcast %28 : vector<8x1xf32> to vector<8x128xf32>
    %36 = arith.subf %14, %35 : vector<8x128xf32>
    %cst_19 = arith.constant 9.99999974E-6 : f32
    %37 = vector.broadcast %cst_19 : f32 to vector<8x1xf32>
    %38 = arith.addf %34, %37 : vector<8x1xf32>
    %39 = math.rsqrt %38 : vector<8x1xf32>
    %40 = vector.broadcast %39 : vector<8x1xf32> to vector<8x128xf32>
    %41 = arith.mulf %36, %40 : vector<8x128xf32>
    %c0_20 = arith.constant 0 : index
    %c0_21 = arith.constant 0 : index
    %42 = vector.load %arg6[%c0_20, %c0_21] : memref<1x128xf32, #tpu.memory_space<vmem>>, vector<1x128xf32>
    %43 = vector.broadcast %42 : vector<1x128xf32> to vector<8x128xf32>
    %44 = arith.mulf %41, %43 : vector<8x128xf32>
    %c0_22 = arith.constant 0 : index
    %c0_23 = arith.constant 0 : index
    %45 = vector.load %arg7[%c0_22, %c0_23] : memref<1x128xf32, #tpu.memory_space<vmem>>, vector<1x128xf32>
    %46 = vector.broadcast %45 : vector<1x128xf32> to vector<8x128xf32>
    %47 = arith.addf %44, %46 : vector<8x128xf32>
    %c0_24 = arith.constant 0 : index
    %c0_25 = arith.constant 0 : index
    %48 = vector.load %arg8[%c0_24, %c0_25] : memref<8x128xf32, #tpu.memory_space<vmem>>, vector<8x128xf32>
    tpu.vector_store %arg8[%c0_24, %c0_25], %47 {strides = array<i32>} : memref<8x128xf32, #tpu.memory_space<vmem>>, vector<8x128xf32>,
    return
  }
  func.func @transform_0(%arg0: i32) -> (i32, i32) {
    %c0_i32 = arith.constant 0 : i32
    %c0_i32_0 = arith.constant 0 : i32
    return %arg0, %c0_i32 : i32, i32
  }
  func.func @transform_1(%arg0: i32) -> (i32, i32) {
    %c0_i32 = arith.constant 0 : i32
    %c0_i32_0 = arith.constant 0 : i32
    %c0_i32_1 = arith.constant 0 : i32
    return %c0_i32, %c0_i32_0 : i32, i32
  }
  func.func @transform_2(%arg0: i32) -> (i32, i32) {
    %c0_i32 = arith.constant 0 : i32
    %c0_i32_0 = arith.constant 0 : i32
    %c0_i32_1 = arith.constant 0 : i32
    return %c0_i32, %c0_i32_0 : i32, i32
  }
  func.func @transform_3(%arg0: i32) -> (i32, i32) {
    %c0_i32 = arith.constant 0 : i32
    %c0_i32_0 = arith.constant 0 : i32
    %c0_i32_1 = arith.constant 0 : i32
    return %c0_i32, %c0_i32_0 : i32, i32
  }
  func.func @transform_4(%arg0: i32) -> (i32, i32) {
    %c0_i32 = arith.constant 0 : i32
    %c0_i32_0 = arith.constant 0 : i32
    %c0_i32_1 = arith.constant 0 : i32
    return %c0_i32, %c0_i32_0 : i32, i32
  }
  func.func @transform_5(%arg0: i32) -> (i32, i32) {
    %c0_i32 = arith.constant 0 : i32
    %c0_i32_0 = arith.constant 0 : i32
    %c0_i32_1 = arith.constant 0 : i32
    return %c0_i32, %c0_i32_0 : i32, i32
  }
  func.func @transform_6(%arg0: i32) -> (i32, i32) {
    %c0_i32 = arith.constant 0 : i32
    %c0_i32_0 = arith.constant 0 : i32
    %c0_i32_1 = arith.constant 0 : i32
    return %c0_i32, %c0_i32_0 : i32, i32
  }
  func.func @transform_7(%arg0: i32) -> (i32, i32) {
    %c0_i32 = arith.constant 0 : i32
    %c0_i32_0 = arith.constant 0 : i32
    return %arg0, %c0_i32 : i32, i32
  }
}

</mosaic_0001>

<bundles_post_ra>
// kernel: tpu_custom_call.1
= control target key start
LH: loop header
LB: loop body
LE: loop exit
PB: predicated region body
PF: predicated region fallthrough
CT: control target
= control target key end

     0   :  { %12 = vsyncpa [#allocation3], 0  ;;  %s700_s0 = inlined_call_operand.hbm [shape: f32[8,128], index: 0, kind: input, shape index: {}]   ;;  %s701_s1 = inlined_call_operand.hbm [shape: f32[128,128], index: 1, kind: input, shape index: {}]   ;;  %s702_s2 = inlined_call_operand.vmem [shape: f32[1,128], index: 2, kind: input, shape index: {}]   ;;  %s703_s3 = inlined_call_operand.hbm [shape: f32[128,128], index: 3, kind: input, shape index: {}]   ;;  %s704_s4 = inlined_call_operand.vmem [shape: f32[1,128], index: 4, kind: input, shape index: {}]   ;;  %s705_s5 = inlined_call_operand.vmem [shape: f32[1,128], index: 5, kind: input, shape index: {}]   ;;  %s706_s6 = inlined_call_operand.vmem [shape: f32[1,128], index: 6, kind: input, shape index: {}]   ;;  %s707_s7 = inlined_call_operand.hbm [shape: f32[8,128], index: 7, kind: output, shape index: {}]  }
   0x1   :  { %13 = vsyncpa [#allocation6], 0 }
   0x2   :  { %14 = vsyncpa [#allocation4], 0  ;;  %s569_s24 = smov [#allocation5]   ;;  %s475_s28 = scalar_lea.hbm %s701_s1, 2048 }
   0x3   :  { %s30_s25 = sshll.u32 %s569_s24, 4  ;;  %p476_p0 = scmp.ne.s32.totalorder %s701_s1, %s475_s28  ;;  %s31_s25 = int_to_ptr.vmem [resolvable:$true] %s30_s25 }
   0x4   :  { %p479_p1 = scmp.lt.u32.totalorder %s475_s28, %s701_s1 }
   0x6   :  { %p481_p2 = pnand %p479_p1, %p476_p0 }
   0x8   :  { %484 = shalt.err (!%p481_p2)
}
   0x9   :  { %s485_s10 = scalar_lea.vmem %s31_s25, 2048  ;;  %p490_p4 = scmp.lt.s32.totalorder %s31_s25, %s31_s25 }
   0xa   :  { %p486_p3 = scmp.ne.s32.totalorder %s31_s25, %s485_s10  ;;  %p491_p5 = scmp.lt.s32.totalorder %s485_s10, %s485_s10 }
   0xc   :  { %p492_p6 = por %p491_p5, %p490_p4 }
   0xe   :  { %p493_p7 = pnand %p492_p6, %p486_p3 }
  0x10   :  { %496 = shalt.err (!%p493_p7)
}
  0x11   :  { %s570_s11 = smov 128   ;;  %s571_s12 = smov 8  }
  0x12   :  { %36 = dma.hbm_to_vmem [thread:$0]  %s701_s1, 2048, %s31_s25, [#allocation6], %s570_s11, %s570_s11, %s571_s12  }
  0x13   :  { %s572_s15 = smov [#allocation2]   ;;  %s573_s17 = smov [#allocation7]  }
  0x14   :  { %s21_s16 = sshll.u32 %s572_s15, 4  ;;  %s44_s18 = sshll.u32 %s573_s17, 4  ;;  %s22_s16 = int_to_ptr.vmem [resolvable:$true] %s21_s16  ;;  %s45_s18 = int_to_ptr.vmem [resolvable:$true] %s44_s18 }
  0x15   :  { %s497_s21 = scalar_lea.hbm %s700_s0, 128 }
  0x16   :  { %p498_p8 = scmp.ne.s32.totalorder %s700_s0, %s497_s21  ;;  %p501_p9 = scmp.lt.u32.totalorder %s497_s21, %s700_s0 }
  0x18   :  { %p503_p10 = pnand %p501_p9, %p498_p8 }
  0x1a   :  { %506 = shalt.err (!%p503_p10)
}
  0x1b   :  { %s507_s1 = scalar_lea.vmem %s22_s16, 128  ;;  %p512_p12 = scmp.lt.s32.totalorder %s22_s16, %s22_s16 }
  0x1c   :  { %p508_p11 = scmp.ne.s32.totalorder %s22_s16, %s507_s1  ;;  %p513_p13 = scmp.lt.s32.totalorder %s507_s1, %s507_s1 }
  0x1e   :  { %p514_p0 = por %p513_p13, %p512_p12 }
  0x20   :  { %p515_p1 = pnand %p514_p0, %p508_p11 }
  0x22   :  { %518 = shalt.err (!%p515_p1)
}
  0x23   :  { %24 = dma.hbm_to_vmem [thread:$0]  %s700_s0, 128, %s22_s16, [#allocation3]  }
  0x24   :  { %s519_s30 = scalar_lea.hbm %s703_s3, 2048 }
  0x25   :  { %p520_p2 = scmp.ne.s32.totalorder %s703_s3, %s519_s30  ;;  %p523_p3 = scmp.lt.u32.totalorder %s519_s30, %s703_s3 }
  0x27   :  { %p525_p4 = pnand %p523_p3, %p520_p2 }
  0x29   :  { %528 = shalt.err (!%p525_p4)
}
  0x2a   :  { %s529_s14 = scalar_lea.vmem %s45_s18, 2048  ;;  %p534_p6 = scmp.lt.s32.totalorder %s45_s18, %s45_s18 }
  0x2b   :  { %p530_p5 = scmp.ne.s32.totalorder %s45_s18, %s529_s14  ;;  %p535_p7 = scmp.lt.s32.totalorder %s529_s14, %s529_s14 }
  0x2d   :  { %p536_p8 = por %p535_p7, %p534_p6 }
  0x2f   :  { %p537_p9 = pnand %p536_p8, %p530_p5 }
  0x31   :  { %540 = shalt.err (!%p537_p9)
}
  0x32   :  { %50 = dma.hbm_to_vmem [thread:$0]  %s703_s3, 2048, %s45_s18, [#allocation6], %s570_s11, %s570_s11, %s571_s12  }
  0x33   :  { %563 = dma.done.wait [#allocation3], 128  }
  0x34   :  { %564 = vsyncadd [#allocation3], 4294967168 }
  0x35   :  { %565 = dma.done.wait [#allocation6], 4096  }
  0x36   :  { %566 = vsyncadd [#allocation6], 4294963200  ;;  %v574_v0 = vmov 0.0|0.0   ;;  %vm575_vm0 = vmmov 0   ;;  %v576_v1 = vmov 0.0   ;;  %v67_v2 = vld [vmem:[#allocation5] sm:$0xff]  ;;  %v255_v56 = vlaneseq }
  0x37   :  { %416 = vmatprep.subr.bf16.mxu0 %v574_v0  ;;  %378 = vmatprep.mubr.msk.f32.mxu0 %vm575_vm0, %v576_v1  ;;  %v68_v3 = vld [vmem:[#allocation5 + $0x8] sm:$0xff]  ;;  %v69_v4 = vld [vmem:[#allocation5 + $0x10] sm:$0xff]  ;;  %v70_v6 = vld [vmem:[#allocation5 + $0x18] sm:$0xff]  ;;  %s577_s19 = smov [#allocation8]  }
  0x38   :  { %440 = vmatprep.subr.bf16.mxu1 %v574_v0  ;;  %413 = vmatprep.mubr.msk.f32.mxu1 %vm575_vm0, %v576_v1  ;;  %v417_v5 = vpack.c.bf16 %v68_v3, %v67_v2  ;;  %v420_v7 = vpack.c.bf16 %v70_v6, %v69_v4  ;;  %v71_v8 = vld [vmem:[#allocation5 + $0x20] sm:$0xff]  ;;  %v72_v9 = vld [vmem:[#allocation5 + $0x28] sm:$0xff]  ;;  %v163_v12 = vld [vmem:[#allocation7 + $0x10] sm:$0xff]  ;;  %v256_v58 = vand.u32 127, %v255_v56  ;;  %s298_s20 = sshll.u32 %s577_s19, 4  ;;  %s299_s20 = int_to_ptr.vmem [resolvable:$true] %s298_s20 }
  0x39   :  { %v161_v10 = vld [vmem:[#allocation7] sm:$0xff]  ;;  %v162_v11 = vld [vmem:[#allocation7 + $0x8] sm:$0xff]  ;;  %v164_v13 = vld [vmem:[#allocation7 + $0x18] sm:$0xff]  ;;  %v423_v14 = vpack.c.bf16 %v72_v9, %v71_v8  ;;  %s541_s21 = scalar_lea.vmem %s299_s20, 128  ;;  %p546_p11 = scmp.lt.s32.totalorder %s299_s20, %s299_s20 }
  0x3a   :  { %418 = vmatpush3.bf16.msra.mxu0 %v417_v5  ;;  %v441_v15 = vpack.c.bf16 %v162_v11, %v161_v10  ;;  %v73_v16 = vld [vmem:[#allocation5 + $0x30] sm:$0xff]  ;;  %v74_v17 = vld [vmem:[#allocation5 + $0x38] sm:$0xff]  ;;  %v444_v18 = vpack.c.bf16 %v164_v13, %v163_v12  ;;  %v165_v19 = vld [vmem:[#allocation7 + $0x20] sm:$0xff]  ;;  %vm257_vm1 = vcmp.lt.s32.totalorder %v256_v58, 32  ;;  %p542_p10 = scmp.ne.s32.totalorder %s299_s20, %s541_s21  ;;  %p547_p12 = scmp.lt.s32.totalorder %s541_s21, %s541_s21 }
  0x3b   :  { %419 = vmatprep.subr.bf16.mxu0 %v574_v0  ;;  %v166_v20 = vld [vmem:[#allocation7 + $0x28] sm:$0xff]  ;;  %v426_v21 = vpack.c.bf16 %v74_v17, %v73_v16  ;;  %v75_v22 = vld [vmem:[#allocation5 + $0x40] sm:$0xff]  ;;  %v167_v25 = vld [vmem:[#allocation7 + $0x30] sm:$0xff] }
  0x3c   :  { %442 = vmatpush3.bf16.msra.mxu1 %v441_v15  ;;  %v76_v23 = vld [vmem:[#allocation5 + $0x48] sm:$0xff]  ;;  %v447_v24 = vpack.c.bf16 %v166_v20, %v165_v19  ;;  %v168_v26 = vld [vmem:[#allocation7 + $0x38] sm:$0xff]  ;;  %v77_v28 = vld [vmem:[#allocation5 + $0x50] sm:$0xff]  ;;  %p548_p13 = por %p547_p12, %p546_p11 }
  0x3d   :  { %443 = vmatprep.subr.bf16.mxu1 %v574_v0  ;;  %v429_v27 = vpack.c.bf16 %v76_v23, %v75_v22  ;;  %v78_v29 = vld [vmem:[#allocation5 + $0x58] sm:$0xff]  ;;  %v450_v30 = vpack.c.bf16 %v168_v26, %v167_v25  ;;  %v169_v31 = vld [vmem:[#allocation7 + $0x40] sm:$0xff]  ;;  %v170_v32 = vld [vmem:[#allocation7 + $0x48] sm:$0xff] }
  0x3e   :  { %421 = vmatpush3.bf16.msra.mxu0 %v420_v7  ;;  %v432_v33 = vpack.c.bf16 %v78_v29, %v77_v28  ;;  %v79_v34 = vld [vmem:[#allocation5 + $0x60] sm:$0xff]  ;;  %v80_v35 = vld [vmem:[#allocation5 + $0x68] sm:$0xff]  ;;  %v453_v36 = vpack.c.bf16 %v170_v32, %v169_v31  ;;  %v171_v37 = vld [vmem:[#allocation7 + $0x50] sm:$0xff]  ;;  %p549_p0 = pnand %p548_p13, %p542_p10 }
  0x3f   :  { %422 = vmatprep.subr.bf16.mxu0 %v574_v0  ;;  %v172_v38 = vld [vmem:[#allocation7 + $0x58] sm:$0xff]  ;;  %v435_v39 = vpack.c.bf16 %v80_v35, %v79_v34  ;;  %v81_v40 = vld [vmem:[#allocation5 + $0x70] sm:$0xff]  ;;  %v173_v43 = vld [vmem:[#allocation7 + $0x60] sm:$0xff] }
  0x40   :  { %445 = vmatpush3.bf16.msra.mxu1 %v444_v18  ;;  %v82_v41 = vld [vmem:[#allocation5 + $0x78] sm:$0xff]  ;;  %v456_v42 = vpack.c.bf16 %v172_v38, %v171_v37  ;;  %v174_v44 = vld [vmem:[#allocation7 + $0x68] sm:$0xff]  ;;  %v175_v48 = vld [vmem:[#allocation7 + $0x70] sm:$0xff] }
  0x41   :  { %446 = vmatprep.subr.bf16.mxu1 %v574_v0  ;;  %v438_v45 = vpack.c.bf16 %v82_v41, %v81_v40  ;;  %v459_v46 = vpack.c.bf16 %v174_v44, %v173_v43  ;;  %v66_v47 = vld [vmem:[#allocation2] sm:$0xff] }
  0x42   :  { %424 = vmatpush3.bf16.msra.mxu0 %v423_v14  ;;  %v176_v49 = vld [vmem:[#allocation7 + $0x78] sm:$0xff] }
  0x43   :  { %425 = vmatprep.subr.bf16.mxu0 %v574_v0  ;;  %v462_v50 = vpack.c.bf16 %v176_v49, %v175_v48  ;;  %v308_v51 = vld [vmem:[%s702_s2] ss:$0 sm:$0xff] }
  0x44   :  { %448 = vmatpush3.bf16.msra.mxu1 %v447_v24  ;;  %v309_v57 = vld [vmem:[%s704_s4] ss:$0 sm:$0xff] }
  0x45   :  { %449 = vmatprep.subr.bf16.mxu1 %v574_v0  ;;  %v310_v11 = vld [vmem:[%s705_s5] ss:$0 sm:$0xff] }
  0x46   :  { %427 = vmatpush3.bf16.msra.mxu0 %v426_v21  ;;  %v311_v13 = vld [vmem:[%s706_s6] ss:$0 sm:$0xff] }
  0x47   :  { %428 = vmatprep.subr.bf16.mxu0 %v574_v0 }
  0x48   :  { %451 = vmatpush3.bf16.msra.mxu1 %v450_v30 }
  0x49   :  { %452 = vmatprep.subr.bf16.mxu1 %v574_v0 }
  0x4a   :  { %430 = vmatpush3.bf16.msra.mxu0 %v429_v27 }
  0x4b   :  { %431 = vmatprep.subr.bf16.mxu0 %v574_v0 }
  0x4c   :  { %454 = vmatpush3.bf16.msra.mxu1 %v453_v36 }
  0x4d   :  { %455 = vmatprep.subr.bf16.mxu1 %v574_v0 }
  0x4e   :  { %433 = vmatpush3.bf16.msra.mxu0 %v432_v33 }
  0x4f   :  { %434 = vmatprep.subr.bf16.mxu0 %v574_v0 }
  0x50   :  { %457 = vmatpush3.bf16.msra.mxu1 %v456_v42 }
  0x51   :  { %458 = vmatprep.subr.bf16.mxu1 %v574_v0 }
  0x52   :  { %436 = vmatpush3.bf16.msra.mxu0 %v435_v39 }
  0x53   :  { %437 = vmatprep.subr.bf16.mxu0 %v574_v0 }
  0x54   :  { %460 = vmatpush3.bf16.msra.mxu1 %v459_v46 }
  0x55   :  { %461 = vmatprep.subr.bf16.mxu1 %v574_v0 }
  0x56   :  { %439 = vmatpush3.bf16.msra.mxu0 %v438_v45 }
  0x58   :  { %463 = vmatpush3.bf16.msra.mxu1 %v462_v50 }
  0x59   :  { %379 = vmatmul.mubr.f32.vlgmr.msra.gmra.mrb[0].mxu0 %v66_v47 }
 0x12c   :  { %v156_v52 = vpop.f32.mrb[0].mxu0 }
 0x12d   :  { %v157_v53 = vadd.f32 %v308_v51, %v156_v52  ;;  %v380_v54 = vpop.f32.mrb[1].mxu0 }
 0x12f   :  { %v160_v55 = vmax.f32 %v157_v53, 0.0 }
 0x131   :  { %414 = vmatmul.mubr.f32.vlgmr.msra.gmra.mrb[0].mxu1 %v160_v55 }
 0x204   :  { %v250_v59 = vpop.f32.mrb[0].mxu1 }
 0x205   :  { %v251_v60 = vadd.f32 %v309_v57, %v250_v59  ;;  %v415_v61 = vpop.f32.mrb[1].mxu1 }
 0x207   :  { %v254_v62 = vadd.f32 %v251_v60, %v66_v47 }
 0x209   :  { %v260_v63 = vsel %vm257_vm1, %v254_v62, 0.0 }
 0x20a   :  { %261 = vadd.xlane.f32.xlu0 %v260_v63  ;;  %v263_v0 = vmul.f32 %v260_v63, %v260_v63 }
 0x20e   :  { %264 = vadd.xlane.f32.xlu0 %v263_v0 }
 0x297   :  { %v262_v1 = vpop.xlane.xlu0 %261 }
 0x298   :  { %v266_v2 = vmul.f32 0.03125, %v262_v1 }
 0x29a   :  { %v268_v4 = vmul.f32 %v266_v2, %v266_v2  ;;  %v271_v9 = vsub.f32 %v254_v62, %v266_v2 }
 0x29b   :  { %v265_v3 = vpop.xlane.xlu0 %264 }
 0x29c   :  { %v267_v5 = vmul.f32 0.03125, %v265_v3 }
 0x29e   :  { %v269_v6 = vsub.f32 %v267_v5, %v268_v4 }
 0x2a0   :  { %v270_v7 = vmax.f32 %v269_v6, 0.0 }
 0x2a2   :  { %v272_v8 = vadd.f32 1e-05, %v270_v7 }
 0x2a4   :  { %473 = vrsqrt.f32 %v272_v8 }
 0x2ae   :  { %v474_v10 = vpop.eup %473 }
 0x2af   :  { %v274_v12 = vmul.f32 %v474_v10, %v271_v9 }
 0x2b1   :  { %v282_v14 = vmul.f32 %v310_v11, %v274_v12 }
 0x2b3   :  { %v290_v15 = vadd.f32 %v311_v13, %v282_v14 }
 0x2b5   :  { %291 = vst [vmem:[#allocation8] sm:$0xff] %v290_v15 }
 0x2b6   :  { %552 = shalt.err (!%p549_p0)
}
 0x2b7   :  { %s553_s23 = scalar_lea.hbm %s707_s7, 128 }
 0x2b8   :  { %p554_p1 = scmp.ne.s32.totalorder %s707_s7, %s553_s23  ;;  %p557_p2 = scmp.lt.u32.totalorder %s553_s23, %s707_s7 }
 0x2ba   :  { %p559_p3 = pnand %p557_p2, %p554_p1 }
 0x2bc   :  { %562 = shalt.err (!%p559_p3)
}
 0x2bd   :  { %301 = dma.vmem_to_hbm [thread:$0]  %s299_s20, 128, %s707_s7, [#allocation4]  }
 0x2be   :  { %567 = dma.done.wait [#allocation4], 128  }
 0x2bf   :  { %568 = vsyncadd [#allocation4], 4294967168 }
 0x2c0   :  { %305 = vsyncpa [#allocation3], 1 }
 0x2c1   :  { %306 = vsyncpa [#allocation6], 1 }
 0x2c2   :  { %307 = vsyncpa [#allocation4], 1 }

// kernel: tpu_custom_call.1
= control target key start
LH: loop header
LB: loop body
LE: loop exit
PB: predicated region body
PF: predicated region fallthrough
CT: control target
= control target key end

     0   :  { %12 = vsyncpa [#allocation3], 0  ;;  %s700_s0 = inlined_call_operand.hbm [shape: f32[8,128], index: 0, kind: input, shape index: {}]   ;;  %s701_s1 = inlined_call_operand.hbm [shape: f32[128,128], index: 1, kind: input, shape index: {}]   ;;  %s702_s2 = inlined_call_operand.vmem [shape: f32[1,128], index: 2, kind: input, shape index: {}]   ;;  %s703_s3 = inlined_call_operand.hbm [shape: f32[128,128], index: 3, kind: input, shape index: {}]   ;;  %s704_s4 = inlined_call_operand.vmem [shape: f32[1,128], index: 4, kind: input, shape index: {}]   ;;  %s705_s5 = inlined_call_operand.vmem [shape: f32[1,128], index: 5, kind: input, shape index: {}]   ;;  %s706_s6 = inlined_call_operand.vmem [shape: f32[1,128], index: 6, kind: input, shape index: {}]   ;;  %s707_s7 = inlined_call_operand.hbm [shape: f32[8,128], index: 7, kind: output, shape index: {}]  }
   0x1   :  { %13 = vsyncpa [#allocation6], 0 }
   0x2   :  { %14 = vsyncpa [#allocation4], 0  ;;  %s569_s24 = smov [#allocation5]   ;;  %s475_s28 = scalar_lea.hbm %s701_s1, 2048 }
   0x3   :  { %s30_s25 = sshll.u32 %s569_s24, 4  ;;  %p476_p0 = scmp.ne.s32.totalorder %s701_s1, %s475_s28  ;;  %s31_s25 = int_to_ptr.vmem [resolvable:$true] %s30_s25 }
   0x4   :  { %p479_p1 = scmp.lt.u32.totalorder %s475_s28, %s701_s1 }
   0x6   :  { %p481_p2 = pnand %p479_p1, %p476_p0 }
   0x8   :  { %484 = shalt.err (!%p481_p2)
}
   0x9   :  { %s485_s10 = scalar_lea.vmem %s31_s25, 2048  ;;  %p490_p4 = scmp.lt.s32.totalorder %s31_s25, %s31_s25 }
   0xa   :  { %p486_p3 = scmp.ne.s32.totalorder %s31_s25, %s485_s10  ;;  %p491_p5 = scmp.lt.s32.totalorder %s485_s10, %s485_s10 }
   0xc   :  { %p492_p6 = por %p491_p5, %p490_p4 }
   0xe   :  { %p493_p7 = pnand %p492_p6, %p486_p3 }
  0x10   :  { %496 = shalt.err (!%p493_p7)
}
  0x11   :  { %s570_s11 = smov 128   ;;  %s571_s12 = smov 8  }
  0x12   :  { %36 = dma.hbm_to_vmem [thread:$0]  %s701_s1, 2048, %s31_s25, [#allocation6], %s570_s11, %s570_s11, %s571_s12  }
  0x13   :  { %s572_s15 = smov [#allocation2]   ;;  %s573_s17 = smov [#allocation7]  }
  0x14   :  { %s21_s16 = sshll.u32 %s572_s15, 4  ;;  %s44_s18 = sshll.u32 %s573_s17, 4  ;;  %s22_s16 = int_to_ptr.vmem [resolvable:$true] %s21_s16  ;;  %s45_s18 = int_to_ptr.vmem [resolvable:$true] %s44_s18 }
  0x15   :  { %s497_s21 = scalar_lea.hbm %s700_s0, 128 }
  0x16   :  { %p498_p8 = scmp.ne.s32.totalorder %s700_s0, %s497_s21  ;;  %p501_p9 = scmp.lt.u32.totalorder %s497_s21, %s700_s0 }
  0x18   :  { %p503_p10 = pnand %p501_p9, %p498_p8 }
  0x1a   :  { %506 = shalt.err (!%p503_p10)
}
  0x1b   :  { %s507_s1 = scalar_lea.vmem %s22_s16, 128  ;;  %p512_p12 = scmp.lt.s32.totalorder %s22_s16, %s22_s16 }
  0x1c   :  { %p508_p11 = scmp.ne.s32.totalorder %s22_s16, %s507_s1  ;;  %p513_p13 = scmp.lt.s32.totalorder %s507_s1, %s507_s1 }
  0x1e   :  { %p514_p0 = por %p513_p13, %p512_p12 }
  0x20   :  { %p515_p1 = pnand %p514_p0, %p508_p11 }
  0x22   :  { %518 = shalt.err (!%p515_p1)
}
  0x23   :  { %24 = dma.hbm_to_vmem [thread:$0]  %s700_s0, 128, %s22_s16, [#allocation3]  }
  0x24   :  { %s519_s30 = scalar_lea.hbm %s703_s3, 2048 }
  0x25   :  { %p520_p2 = scmp.ne.s32.totalorder %s703_s3, %s519_s30  ;;  %p523_p3 = scmp.lt.u32.totalorder %s519_s30, %s703_s3 }
  0x27   :  { %p525_p4 = pnand %p523_p3, %p520_p2 }
  0x29   :  { %528 = shalt.err (!%p525_p4)
}
  0x2a   :  { %s529_s14 = scalar_lea.vmem %s45_s18, 2048  ;;  %p534_p6 = scmp.lt.s32.totalorder %s45_s18, %s45_s18 }
  0x2b   :  { %p530_p5 = scmp.ne.s32.totalorder %s45_s18, %s529_s14  ;;  %p535_p7 = scmp.lt.s32.totalorder %s529_s14, %s529_s14 }
  0x2d   :  { %p536_p8 = por %p535_p7, %p534_p6 }
  0x2f   :  { %p537_p9 = pnand %p536_p8, %p530_p5 }
  0x31   :  { %540 = shalt.err (!%p537_p9)
}
  0x32   :  { %50 = dma.hbm_to_vmem [thread:$0]  %s703_s3, 2048, %s45_s18, [#allocation6], %s570_s11, %s570_s11, %s571_s12  }
  0x33   :  { %563 = dma.done.wait [#allocation3], 128  }
  0x34   :  { %564 = vsyncadd [#allocation3], 4294967168 }
  0x35   :  { %565 = dma.done.wait [#allocation6], 4096  }
  0x36   :  { %566 = vsyncadd [#allocation6], 4294963200  ;;  %v574_v0 = vmov 0.0|0.0   ;;  %vm575_vm0 = vmmov 0   ;;  %v576_v1 = vmov 0.0   ;;  %v67_v2 = vld [vmem:[#allocation5] sm:$0xff]  ;;  %v255_v56 = vlaneseq }
  0x37   :  { %416 = vmatprep.subr.bf16.mxu0 %v574_v0  ;;  %378 = vmatprep.mubr.msk.f32.mxu0 %vm575_vm0, %v576_v1  ;;  %v68_v3 = vld [vmem:[#allocation5 + $0x8] sm:$0xff]  ;;  %v69_v4 = vld [vmem:[#allocation5 + $0x10] sm:$0xff]  ;;  %v70_v6 = vld [vmem:[#allocation5 + $0x18] sm:$0xff]  ;;  %s577_s19 = smov [#allocation8]  }
  0x38   :  { %440 = vmatprep.subr.bf16.mxu1 %v574_v0  ;;  %413 = vmatprep.mubr.msk.f32.mxu1 %vm575_vm0, %v576_v1  ;;  %v417_v5 = vpack.c.bf16 %v68_v3, %v67_v2  ;;  %v420_v7 = vpack.c.bf16 %v70_v6, %v69_v4  ;;  %v71_v8 = vld [vmem:[#allocation5 + $0x20] sm:$0xff]  ;;  %v72_v9 = vld [vmem:[#allocation5 + $0x28] sm:$0xff]  ;;  %v163_v12 = vld [vmem:[#allocation7 + $0x10] sm:$0xff]  ;;  %v256_v58 = vand.u32 127, %v255_v56  ;;  %s298_s20 = sshll.u32 %s577_s19, 4  ;;  %s299_s20 = int_to_ptr.vmem [resolvable:$true] %s298_s20 }
  0x39   :  { %v161_v10 = vld [vmem:[#allocation7] sm:$0xff]  ;;  %v162_v11 = vld [vmem:[#allocation7 + $0x8] sm:$0xff]  ;;  %v164_v13 = vld [vmem:[#allocation7 + $0x18] sm:$0xff]  ;;  %v423_v14 = vpack.c.bf16 %v72_v9, %v71_v8  ;;  %s541_s21 = scalar_lea.vmem %s299_s20, 128  ;;  %p546_p11 = scmp.lt.s32.totalorder %s299_s20, %s299_s20 }
  0x3a   :  { %418 = vmatpush3.bf16.msra.mxu0 %v417_v5  ;;  %v441_v15 = vpack.c.bf16 %v162_v11, %v161_v10  ;;  %v73_v16 = vld [vmem:[#allocation5 + $0x30] sm:$0xff]  ;;  %v74_v17 = vld [vmem:[#allocation5 + $0x38] sm:$0xff]  ;;  %v444_v18 = vpack.c.bf16 %v164_v13, %v163_v12  ;;  %v165_v19 = vld [vmem:[#allocation7 + $0x20] sm:$0xff]  ;;  %vm257_vm1 = vcmp.lt.s32.totalorder %v256_v58, 32  ;;  %p542_p10 = scmp.ne.s32.totalorder %s299_s20, %s541_s21  ;;  %p547_p12 = scmp.lt.s32.totalorder %s541_s21, %s541_s21 }
  0x3b   :  { %419 = vmatprep.subr.bf16.mxu0 %v574_v0  ;;  %v166_v20 = vld [vmem:[#allocation7 + $0x28] sm:$0xff]  ;;  %v426_v21 = vpack.c.bf16 %v74_v17, %v73_v16  ;;  %v75_v22 = vld [vmem:[#allocation5 + $0x40] sm:$0xff]  ;;  %v167_v25 = vld [vmem:[#allocation7 + $0x30] sm:$0xff] }
  0x3c   :  { %442 = vmatpush3.bf16.msra.mxu1 %v441_v15  ;;  %v76_v23 = vld [vmem:[#allocation5 + $0x48] sm:$0xff]  ;;  %v447_v24 = vpack.c.bf16 %v166_v20, %v165_v19  ;;  %v168_v26 = vld [vmem:[#allocation7 + $0x38] sm:$0xff]  ;;  %v77_v28 = vld [vmem:[#allocation5 + $0x50] sm:$0xff]  ;;  %p548_p13 = por %p547_p12, %p546_p11 }
  0x3d   :  { %443 = vmatprep.subr.bf16.mxu1 %v574_v0  ;;  %v429_v27 = vpack.c.bf16 %v76_v23, %v75_v22  ;;  %v78_v29 = vld [vmem:[#allocation5 + $0x58] sm:$0xff]  ;;  %v450_v30 = vpack.c.bf16 %v168_v26, %v167_v25  ;;  %v169_v31 = vld [vmem:[#allocation7 + $0x40] sm:$0xff]  ;;  %v170_v32 = vld [vmem:[#allocation7 + $0x48] sm:$0xff] }
  0x3e   :  { %421 = vmatpush3.bf16.msra.mxu0 %v420_v7  ;;  %v432_v33 = vpack.c.bf16 %v78_v29, %v77_v28  ;;  %v79_v34 = vld [vmem:[#allocation5 + $0x60] sm:$0xff]  ;;  %v80_v35 = vld [vmem:[#allocation5 + $0x68] sm:$0xff]  ;;  %v453_v36 = vpack.c.bf16 %v170_v32, %v169_v31  ;;  %v171_v37 = vld [vmem:[#allocation7 + $0x50] sm:$0xff]  ;;  %p549_p0 = pnand %p548_p13, %p542_p10 }
  0x3f   :  { %422 = vmatprep.subr.bf16.mxu0 %v574_v0  ;;  %v172_v38 = vld [vmem:[#allocation7 + $0x58] sm:$0xff]  ;;  %v435_v39 = vpack.c.bf16 %v80_v35, %v79_v34  ;;  %v81_v40 = vld [vmem:[#allocation5 + $0x70] sm:$0xff]  ;;  %v173_v43 = vld [vmem:[#allocation7 + $0x60] sm:$0xff] }
  0x40   :  { %445 = vmatpush3.bf16.msra.mxu1 %v444_v18  ;;  %v82_v41 = vld [vmem:[#allocation5 + $0x78] sm:$0xff]  ;;  %v456_v42 = vpack.c.bf16 %v172_v38, %v171_v37  ;;  %v174_v44 = vld [vmem:[#allocation7 + $0x68] sm:$0xff]  ;;  %v175_v48 = vld [vmem:[#allocation7 + $0x70] sm:$0xff] }
  0x41   :  { %446 = vmatprep.subr.bf16.mxu1 %v574_v0  ;;  %v438_v45 = vpack.c.bf16 %v82_v41, %v81_v40  ;;  %v459_v46 = vpack.c.bf16 %v174_v44, %v173_v43  ;;  %v66_v47 = vld [vmem:[#allocation2] sm:$0xff] }
  0x42   :  { %424 = vmatpush3.bf16.msra.mxu0 %v423_v14  ;;  %v176_v49 = vld [vmem:[#allocation7 + $0x78] sm:$0xff] }
  0x43   :  { %425 = vmatprep.subr.bf16.mxu0 %v574_v0  ;;  %v462_v50 = vpack.c.bf16 %v176_v49, %v175_v48  ;;  %v308_v51 = vld [vmem:[%s702_s2] ss:$0 sm:$0xff] }
  0x44   :  { %448 = vmatpush3.bf16.msra.mxu1 %v447_v24  ;;  %v309_v57 = vld [vmem:[%s704_s4] ss:$0 sm:$0xff] }
  0x45   :  { %449 = vmatprep.subr.bf16.mxu1 %v574_v0  ;;  %v310_v11 = vld [vmem:[%s705_s5] ss:$0 sm:$0xff] }
  0x46   :  { %427 = vmatpush3.bf16.msra.mxu0 %v426_v21  ;;  %v311_v13 = vld [vmem:[%s706_s6] ss:$0 sm:$0xff] }
  0x47   :  { %428 = vmatprep.subr.bf16.mxu0 %v574_v0 }
  0x48   :  { %451 = vmatpush3.bf16.msra.mxu1 %v450_v30 }
  0x49   :  { %452 = vmatprep.subr.bf16.mxu1 %v574_v0 }
  0x4a   :  { %430 = vmatpush3.bf16.msra.mxu0 %v429_v27 }
  0x4b   :  { %431 = vmatprep.subr.bf16.mxu0 %v574_v0 }
  0x4c   :  { %454 = vmatpush3.bf16.msra.mxu1 %v453_v36 }
  0x4d   :  { %455 = vmatprep.subr.bf16.mxu1 %v574_v0 }
  0x4e   :  { %433 = vmatpush3.bf16.msra.mxu0 %v432_v33 }
  0x4f   :  { %434 = vmatprep.subr.bf16.mxu0 %v574_v0 }
  0x50   :  { %457 = vmatpush3.bf16.msra.mxu1 %v456_v42 }
  0x51   :  { %458 = vmatprep.subr.bf16.mxu1 %v574_v0 }
  0x52   :  { %436 = vmatpush3.bf16.msra.mxu0 %v435_v39 }
  0x53   :  { %437 = vmatprep.subr.bf16.mxu0 %v574_v0 }
  0x54   :  { %460 = vmatpush3.bf16.msra.mxu1 %v459_v46 }
  0x55   :  { %461 = vmatprep.subr.bf16.mxu1 %v574_v0 }
  0x56   :  { %439 = vmatpush3.bf16.msra.mxu0 %v438_v45 }
  0x58   :  { %463 = vmatpush3.bf16.msra.mxu1 %v462_v50 }
  0x59   :  { %379 = vmatmul.mubr.f32.vlgmr.msra.gmra.mrb[0].mxu0 %v66_v47 }
 0x12c   :  { %v156_v52 = vpop.f32.mrb[0].mxu0 }
 0x12d   :  { %v157_v53 = vadd.f32 %v308_v51, %v156_v52  ;;  %v380_v54 = vpop.f32.mrb[1].mxu0 }
 0x12f   :  { %v160_v55 = vmax.f32 %v157_v53, 0.0 }
 0x131   :  { %414 = vmatmul.mubr.f32.vlgmr.msra.gmra.mrb[0].mxu1 %v160_v55 }
 0x204   :  { %v250_v59 = vpop.f32.mrb[0].mxu1 }
 0x205   :  { %v251_v60 = vadd.f32 %v309_v57, %v250_v59  ;;  %v415_v61 = vpop.f32.mrb[1].mxu1 }
 0x207   :  { %v254_v62 = vadd.f32 %v251_v60, %v66_v47 }
 0x209   :  { %v260_v63 = vsel %vm257_vm1, %v254_v62, 0.0 }
 0x20a   :  { %261 = vadd.xlane.f32.xlu0 %v260_v63  ;;  %v263_v0 = vmul.f32 %v260_v63, %v260_v63 }
 0x20e   :  { %264 = vadd.xlane.f32.xlu0 %v263_v0 }
 0x297   :  { %v262_v1 = vpop.xlane.xlu0 %261 }
 0x298   :  { %v266_v2 = vmul.f32 0.03125, %v262_v1 }
 0x29a   :  { %v268_v4 = vmul.f32 %v266_v2, %v266_v2  ;;  %v271_v9 = vsub.f32 %v254_v62, %v266_v2 }
 0x29b   :  { %v265_v3 = vpop.xlane.xlu0 %264 }
 0x29c   :  { %v267_v5 = vmul.f32 0.03125, %v265_v3 }
 0x29e   :  { %v269_v6 = vsub.f32 %v267_v5, %v268_v4 }
 0x2a0   :  { %v270_v7 = vmax.f32 %v269_v6, 0.0 }
 0x2a2   :  { %v272_v8 = vadd.f32 1e-05, %v270_v7 }
 0x2a4   :  { %473 = vrsqrt.f32 %v272_v8 }
 0x2ae   :  { %v474_v10 = vpop.eup %473 }
 0x2af   :  { %v274_v12 = vmul.f32 %v474_v10, %v271_v9 }
 0x2b1   :  { %v282_v14 = vmul.f32 %v310_v11, %v274_v12 }
 0x2b3   :  { %v290_v15 = vadd.f32 %v311_v13, %v282_v14 }
 0x2b5   :  { %291 = vst [vmem:[#allocation8] sm:$0xff] %v290_v15 }
 0x2b6   :  { %552 = shalt.err (!%p549_p0)
}
 0x2b7   :  { %s553_s23 = scalar_lea.hbm %s707_s7, 128 }
 0x2b8   :  { %p554_p1 = scmp.ne.s32.totalorder %s707_s7, %s553_s23  ;;  %p557_p2 = scmp.lt.u32.totalorder %s553_s23, %s707_s7 }
 0x2ba   :  { %p559_p3 = pnand %p557_p2, %p554_p1 }
 0x2bc   :  { %562 = shalt.err (!%p559_p3)
}
 0x2bd   :  { %301 = dma.vmem_to_hbm [thread:$0]  %s299_s20, 128, %s707_s7, [#allocation4]  }
 0x2be   :  { %567 = dma.done.wait [#allocation4], 128  }
 0x2bf   :  { %568 = vsyncadd [#allocation4], 4294967168 }
 0x2c0   :  { %305 = vsyncpa [#allocation3], 1 }
 0x2c1   :  { %306 = vsyncpa [#allocation6], 1 }
 0x2c2   :  { %307 = vsyncpa [#allocation4], 1 }

</bundles_post_ra>
